<compile_context>
chip_gen: v5e
topology: v5e:2x2
jax: 0.10.0
libtpu: 0.0.40
codegen_flags: <defaults>
</compile_context>

<pallas_src>
import math
import functools

import jax
import jax.numpy as jnp
import numpy as np
from jax import lax
from jax.experimental import pallas as pl
from jax.experimental.pallas import tpu as pltpu


def _pe_dropout_kernel(seed_ref, x_ref, pe_ref, o_ref, *, p, train, tb, row_len):
    """One grid step handles a (tb, S*D) slab of batch rows.

    seed_ref : SMEM scalar-prefetch ref, shape (1,) int32
    x_ref    : (tb, S*D) VMEM tile of the input (lane-dense batch rows)
    pe_ref   : (1,  S*D) VMEM tile of the positional-encoding table (resident)
    o_ref    : (tb, S*D) VMEM output tile
    """
    # Hot path: elementwise add; pe row broadcasts over the batch-row sublanes.
    y = x_ref[...] + pe_ref[...]

    if train and p > 0.0:
        if p >= 1.0:
            y = jnp.zeros_like(y)
        else:
            keep_prob = 1.0 - p
            # Keep iff low 24 hash bits < keep_prob * 2^24 (integer-domain compare).
            threshold = jnp.uint32(int(round(keep_prob * float(1 << 24))))
            row0 = pl.program_id(0) * tb
            rows = lax.broadcasted_iota(jnp.int32, (tb, row_len), 0) + row0
            cols = lax.broadcasted_iota(jnp.int32, (tb, row_len), 1)
            idx = (rows * row_len + cols).astype(jnp.uint32)
            seed = seed_ref[0].astype(jnp.uint32)
            # Stateless murmur3 fmix32 of (element index ^ scrambled seed).
            h = idx ^ (seed * jnp.uint32(0x9E3779B9))
            h = h ^ (h >> 16)
            h = h * jnp.uint32(0x85EBCA6B)
            h = h ^ (h >> 13)
            h = h * jnp.uint32(0xC2B2AE35)
            h = h ^ (h >> 16)
            keep = (h & jnp.uint32(0x00FFFFFF)) < threshold
            y = jnp.where(keep, y * jnp.float32(1.0 / keep_prob), jnp.float32(0.0))

    o_ref[...] = y.astype(o_ref.dtype)


def make_positional_encoding_table(max_len, d_model, dtype=jnp.float32):
    """Deterministic buffer identical to the PyTorch __init__ (no checkpoint load)."""
    position = jnp.arange(max_len, dtype=jnp.float32)[:, None]            # (max_len, 1)
    div_term = jnp.exp(
        jnp.arange(0, d_model, 2, dtype=jnp.float32) * (-math.log(10000.0) / d_model)
    )                                                                      # (d_model/2,)
    pe = jnp.zeros((max_len, d_model), jnp.float32)
    pe = pe.at[:, 0::2].set(jnp.sin(position * div_term))
    pe = pe.at[:, 1::2].set(jnp.cos(position * div_term))
    return pe.astype(dtype)


def positional_encoding_forward(x, pe_table, *, p=0.1, train=True, seed=0):
    """x: (B, S, D).  Returns dropout(x + pe[:S]) with PyTorch forward semantics."""
    B, S, D = x.shape
    row_len = S * D
    itemsize = jnp.dtype(x.dtype).itemsize

    # Lane-dense view: one batch element == one row of S*D contiguous lanes.
    # (Contiguous reshape -> free layout change in the wrapper, no copy kernel.)
    x2 = x.reshape(B, row_len)
    pe2 = pe_table[:S].astype(x.dtype).reshape(1, row_len)

    # Batch-row slab sized for ~2 MiB: amortizes the per-grid-step overhead while
    # 2x double-buffered (x + out) tiles plus the resident pe row fit scoped VMEM
    # on every generation (v5e/v6e default 16/32 MiB, v7x 64 MiB physical).
    target_bytes = 2 * 1024 * 1024
    rows_target = max(1, target_bytes // max(1, row_len * itemsize))
    if rows_target >= B or B <= 8:
        tb = B                                   # full batch in one slab
    else:
        tb = max(8, min((rows_target // 8) * 8, (B // 8) * 8))
    grid = (pl.cdiv(B, tb),)

    # VMEM budget: double-buffered x/out tiles + pe (+ slack), capped at v7x phys.
    tile_bytes = tb * row_len * itemsize
    pe_bytes = row_len * itemsize
    est = 2 * 2 * tile_bytes + 2 * pe_bytes + (1 << 20)
    vmem_limit = int(min(64 * 1024 * 1024, max(16 * 1024 * 1024, 2 * est)))

    kernel = functools.partial(
        _pe_dropout_kernel, p=float(p), train=bool(train), tb=tb, row_len=row_len
    )
    out2 = pl.pallas_call(
        kernel,
        out_shape=jax.ShapeDtypeStruct((B, row_len), x.dtype),
        grid_spec=pltpu.PrefetchScalarGridSpec(
            num_scalar_prefetch=1,                      # dropout seed lives in SMEM
            grid=grid,
            in_specs=[
                pl.BlockSpec((tb, row_len), lambda i, *_: (i, 0)),   # x slab per step
                pl.BlockSpec((1, row_len), lambda i, *_: (0, 0)),    # shared pe row
            ],
            out_specs=pl.BlockSpec((tb, row_len), lambda i, *_: (i, 0)),
        ),
        compiler_params=pltpu.CompilerParams(
            # Stateless hash RNG -> batch steps independent -> shard across TCs (v7x).
            dimension_semantics=("parallel",),
            vmem_limit_bytes=vmem_limit,
        ),
    )(jnp.asarray([seed], jnp.int32), x2, pe2)
    return out2.reshape(B, S, D)


if __name__ == "__main__":
    # Small shapes consistent with the module: batch=2, seq=8, d_model=32.
    B, S, D = 2, 8, 32
    MAX_LEN = 5000
    DROPOUT_P = 0.1

    key = jax.random.PRNGKey(0)
    x = jax.random.normal(key, (B, S, D), dtype=jnp.float32)
    pe_table = make_positional_encoding_table(MAX_LEN, D)

    # 1) eval mode (dropout = identity): exact math of x + pe[:S]
    out_eval = positional_encoding_forward(x, pe_table, p=DROPOUT_P, train=False)
    out_eval = jax.block_until_ready(out_eval)
    ref = x + pe_table[:S][None, :, :]
    np.testing.assert_allclose(np.asarray(out_eval), np.asarray(ref), rtol=1e-6, atol=1e-6)

    # 2) train mode: dropout mask from the in-kernel stateless hash
    #    (deterministic given the seed, but not bit-identical to torch's RNG stream)
    out_train = positional_encoding_forward(
        x, pe_table, p=DROPOUT_P, train=True, seed=1234
    )
    out_train = jax.block_until_ready(out_train)
    assert out_train.shape == (B, S, D)
    assert bool(jnp.all(jnp.isfinite(out_train)))
    out_np = np.asarray(out_train)
    ref_np = np.asarray(ref)
    kept = out_np != 0.0
    # surviving elements equal ref / keep_prob, dropped elements equal 0
    np.testing.assert_allclose(
        out_np[kept], (ref_np / (1.0 - DROPOUT_P))[kept], rtol=1e-5, atol=1e-5
    )
    # with p=0.1 over 512 elements, both kept and dropped entries exist w.p. ~1
    assert 0 < int(kept.sum()) < kept.size

    print("KERNEL_OK")
</pallas_src>

<mosaic_0001>
module attributes {stable_mosaic.version = 11 : i64} {
  func.func @_pe_dropout_kernel(%arg0: i32, %arg1: memref<1xi32, #tpu.memory_space<smem>>, %arg2: memref<2x256xf32, #tpu.memory_space<vmem>>, %arg3: memref<1x256xf32, #tpu.memory_space<vmem>>, %arg4: memref<2x256xf32, #tpu.memory_space<vmem>>) attributes {dimension_semantics = [#tpu.dimension_semantics<parallel>], iteration_bounds = array<i64: 1>, scalar_prefetch = 1 : i64, scratch_operands = 0 : i64, tpu.core_type = #tpu.core_type<tc>, window_params = [{transform_indices = @transform_0, window_bounds = array<i64: 2, 256>}, {pipeline_mode = #tpu.pipeline_mode<synchronous>, transform_indices = @transform_1, window_bounds = array<i64: 1, 256>}, {transform_indices = @transform_2, window_bounds = array<i64: 2, 256>}]} {
    %c0 = arith.constant 0 : index
    %c0_0 = arith.constant 0 : index
    %0 = vector.load %arg2[%c0, %c0_0] : memref<2x256xf32, #tpu.memory_space<vmem>>, vector<2x256xf32>
    %c0_1 = arith.constant 0 : index
    %c0_2 = arith.constant 0 : index
    %1 = vector.load %arg3[%c0_1, %c0_2] : memref<1x256xf32, #tpu.memory_space<vmem>>, vector<1x256xf32>
    %2 = vector.broadcast %1 : vector<1x256xf32> to vector<2x256xf32>
    %3 = arith.addf %0, %2 : vector<2x256xf32>
    %c0_3 = arith.constant 0 : index
    %c0_4 = arith.constant 0 : index
    %4 = vector.load %arg4[%c0_3, %c0_4] : memref<2x256xf32, #tpu.memory_space<vmem>>, vector<2x256xf32>
    tpu.vector_store %arg4[%c0_3, %c0_4], %3 {strides = array<i32>} : memref<2x256xf32, #tpu.memory_space<vmem>>, vector<2x256xf32>,
    return
  }
  func.func @transform_0(%arg0: i32, %arg1: memref<1xi32, #tpu.memory_space<smem>>) -> (i32, i32) {
    %c0_i32 = arith.constant 0 : i32
    %c0_i32_0 = arith.constant 0 : i32
    return %arg0, %c0_i32 : i32, i32
  }
  func.func @transform_1(%arg0: i32, %arg1: memref<1xi32, #tpu.memory_space<smem>>) -> (i32, i32) {
    %c0_i32 = arith.constant 0 : i32
    %c0_i32_0 = arith.constant 0 : i32
    %c0_i32_1 = arith.constant 0 : i32
    return %c0_i32, %c0_i32_0 : i32, i32
  }
  func.func @transform_2(%arg0: i32, %arg1: memref<1xi32, #tpu.memory_space<smem>>) -> (i32, i32) {
    %c0_i32 = arith.constant 0 : i32
    %c0_i32_0 = arith.constant 0 : i32
    return %arg0, %c0_i32 : i32, i32
  }
}

</mosaic_0001>

<bundles_post_ra>
// kernel: tpu_custom_call.1
= control target key start
LH: loop header
LB: loop body
LE: loop exit
PB: predicated region body
PF: predicated region fallthrough
CT: control target
= control target key end

     0   :  { %9 = vsyncpa [#allocation5], 0  ;;  %s141_s0 = inlined_call_operand.<no memory space> [shape: s32[1], index: 0, kind: input, shape index: {}]   ;;  %s142_s1 = inlined_call_operand.hbm [shape: f32[2,256], index: 1, kind: input, shape index: {}]   ;;  %s143_s2 = inlined_call_operand.vmem [shape: f32[1,256], index: 2, kind: input, shape index: {}]   ;;  %s144_s3 = inlined_call_operand.hbm [shape: f32[2,256], index: 3, kind: output, shape index: {}]  }
   0x1   :  { %10 = vsyncpa [#allocation6], 0  ;;  %s16_s14 = sshll.u32 %s142_s1, 4  ;;  %s110_s15 = smov [#allocation4]   ;;  %s17_s14 = int_to_ptr.hbm [resolvable:$true] %s16_s14 }
   0x2   :  { %s18_s16 = sshll.u32 %s110_s15, 4  ;;  %s19_s16 = int_to_ptr.vmem [resolvable:$true] %s18_s16 }
   0x3   :  { %21 = dma.hbm_to_vmem [thread:$0]  %s17_s14, 64, %s19_s16, [#allocation5]  }
   0x4   :  { %106 = dma.done.wait [#allocation5], 64  }
   0x5   :  { %107 = vsyncadd [#allocation5], 4294967232  ;;  %v29_v0 = vld [vmem:[%s143_s2] sm:$0x3]  ;;  %vm34_vm0 = vcmask 1041408   ;;  %s111_s18 = smov [#allocation7]  }
   0x6   :  { %v31_v1 = vperm.slane %v29_v0, 0  ;;  %v32_v2 = vperm.slane %v29_v0, 1  ;;  %v28_v3 = vld [vmem:[#allocation4] sm:$0xf]  ;;  %s44_s19 = sshll.u32 %s111_s18, 4  ;;  %s46_s21 = sshll.u32 %s144_s3, 4  ;;  %s45_s19 = int_to_ptr.vmem [resolvable:$true] %s44_s19  ;;  %s47_s21 = int_to_ptr.hbm [resolvable:$true] %s46_s21 }
   0x8   :  { %v33_v4 = vrot.slane %v32_v2, 6 }
   0xa   :  { %v35_v5 = vsel %vm34_vm0, %v31_v1, %v33_v4 }
   0xb   :  { %v37_v6 = vadd.f32 %v35_v5, %v28_v3 }
   0xd   :  { %38 = vst [vmem:[#allocation7] sm:$0xf] %v37_v6 }
   0xe   :  { %49 = dma.vmem_to_hbm [thread:$0]  %s45_s19, 64, %s47_s21, [#allocation6]  }
   0xf   :  { %108 = dma.done.wait [#allocation6], 64  }
  0x10   :  { %109 = vsyncadd [#allocation6], 4294967232 }
  0x11   :  { %54 = vsyncpa [#allocation5], 1 }
  0x12   :  { %55 = vsyncpa [#allocation6], 1 }

</bundles_post_ra>
